<compile_context>
chip_gen: v5e
topology: v5e:2x2
jax: 0.10.0
libtpu: 0.0.40
codegen_flags: <defaults>
</compile_context>

<pallas_src>
import jax
import jax.numpy as jnp
from jax.experimental import pallas as pl
from jax.experimental.pallas import tpu as pltpu


_LANE = 128
_MAX_BLOCK_ROWS = 4096  # 4096 x 128 x 4B = 2 MiB per f32 block (x4 live in VMEM)


def _mish_kernel(x_ref, o_ref):
    x = x_ref[...].astype(jnp.float32)
    # tanh(softplus(x)) == (t^2 + 2t) / (t^2 + 2t + 2) with t = exp(x).
    # Clamp x before exp so t^2 stays finite; the identity already rounds to
    # 1.0 in f32 well before x = 20, so the clamp is exact.
    t = jnp.exp(jnp.minimum(x, 20.0))
    num = t * t + 2.0 * t
    y = x * (num / (num + 2.0))
    o_ref[...] = y.astype(o_ref.dtype)


def mish(x: jax.Array) -> jax.Array:
    """Elementwise Mish: x * tanh(softplus(x)). Accepts any shape (NCHW here)."""
    orig_shape = x.shape
    orig_dtype = x.dtype
    total = x.size
    if total == 0:
        return x

    x_flat = jnp.ravel(x)
    padded = pl.cdiv(total, _LANE) * _LANE
    needs_pad = padded != total
    if needs_pad:
        # Only materialize a padded copy when the flat size is not lane-aligned
        # (pads at most 127 elements; mish of the garbage tail is discarded).
        x_flat = jnp.pad(x_flat, (0, padded - total))
    rows = padded // _LANE
    x2d = x_flat.reshape(rows, _LANE)

    # Block-row selection: big (2 MiB) blocks for large inputs; for smaller
    # inputs still give the grid >=2 steps so both v7x TensorCores get work.
    if rows > _MAX_BLOCK_ROWS:
        block_rows = _MAX_BLOCK_ROWS
    elif rows > 8:
        block_rows = min(rows, ((rows + 1) // 2 + 7) // 8 * 8)
    else:
        block_rows = rows  # full-dim block is always legal
    grid = (pl.cdiv(rows, block_rows),)  # ragged last block is masked by Pallas

    out2d = pl.pallas_call(
        _mish_kernel,
        out_shape=jax.ShapeDtypeStruct((rows, _LANE), orig_dtype),
        grid_spec=pltpu.PrefetchScalarGridSpec(
            num_scalar_prefetch=0,
            grid=grid,
            in_specs=[pl.BlockSpec((block_rows, _LANE), lambda i: (i, 0))],
            out_specs=pl.BlockSpec((block_rows, _LANE), lambda i: (i, 0)),
        ),
        compiler_params=pltpu.CompilerParams(
            dimension_semantics=("parallel",),
            vmem_limit_bytes=32 * 1024 * 1024,
        ),
    )(x2d)

    if needs_pad:
        return out2d.reshape(-1)[:total].reshape(orig_shape)
    return out2d.reshape(orig_shape)


def _mish_ref(x):
    xf = x.astype(jnp.float32)
    sp = jnp.maximum(xf, 0.0) + jnp.log1p(jnp.exp(-jnp.abs(xf)))
    return (xf * jnp.tanh(sp)).astype(x.dtype)


if __name__ == "__main__":
    key = jax.random.PRNGKey(0)
    # NCHW input consistent with the CSPDarknet usage
    x = jax.random.normal(key, (2, 4, 16, 16), dtype=jnp.float32) * 3.0

    y = mish(x)
    jax.block_until_ready(y)

    y_ref = _mish_ref(x)
    assert y.shape == x.shape and y.dtype == x.dtype
    assert jnp.allclose(y, y_ref, atol=1e-5, rtol=1e-5)

    # also exercise a non-lane-aligned size to hit the (minimal) padding path
    x2 = jax.random.normal(jax.random.PRNGKey(1), (3, 5, 7, 3), dtype=jnp.float32) * 4.0
    y2 = mish(x2)
    jax.block_until_ready(y2)
    assert jnp.allclose(y2, _mish_ref(x2), atol=1e-5, rtol=1e-5)

    print("KERNEL_OK")
</pallas_src>

<mosaic_0001>
module attributes {stable_mosaic.version = 11 : i64} {
  func.func @_mish_kernel(%arg0: i32, %arg1: memref<8x128xf32, #tpu.memory_space<vmem>>, %arg2: memref<8x128xf32, #tpu.memory_space<vmem>>) attributes {dimension_semantics = [#tpu.dimension_semantics<parallel>], iteration_bounds = array<i64: 2>, scalar_prefetch = 0 : i64, scratch_operands = 0 : i64, tpu.core_type = #tpu.core_type<tc>, window_params = [{transform_indices = @transform_0, window_bounds = array<i64: 8, 128>}, {transform_indices = @transform_1, window_bounds = array<i64: 8, 128>}]} {
    %c0 = arith.constant 0 : index
    %c0_0 = arith.constant 0 : index
    %0 = vector.load %arg1[%c0, %c0_0] : memref<8x128xf32, #tpu.memory_space<vmem>>, vector<8x128xf32>
    %cst = arith.constant 2.000000e+01 : f32
    %1 = vector.broadcast %cst : f32 to vector<8x128xf32>
    %2 = arith.minimumf %0, %1 : vector<8x128xf32>
    %3 = math.exp %2 : vector<8x128xf32>
    %4 = arith.mulf %3, %3 : vector<8x128xf32>
    %cst_1 = arith.constant 2.000000e+00 : f32
    %5 = vector.broadcast %cst_1 : f32 to vector<8x128xf32>
    %6 = arith.mulf %5, %3 : vector<8x128xf32>
    %7 = arith.addf %4, %6 : vector<8x128xf32>
    %cst_2 = arith.constant 2.000000e+00 : f32
    %8 = vector.broadcast %cst_2 : f32 to vector<8x128xf32>
    %9 = arith.addf %7, %8 : vector<8x128xf32>
    %10 = arith.divf %7, %9 : vector<8x128xf32>
    %11 = arith.mulf %0, %10 : vector<8x128xf32>
    %c0_3 = arith.constant 0 : index
    %c0_4 = arith.constant 0 : index
    %12 = vector.load %arg2[%c0_3, %c0_4] : memref<8x128xf32, #tpu.memory_space<vmem>>, vector<8x128xf32>
    tpu.vector_store %arg2[%c0_3, %c0_4], %11 {strides = array<i32>} : memref<8x128xf32, #tpu.memory_space<vmem>>, vector<8x128xf32>,
    return
  }
  func.func @transform_0(%arg0: i32) -> (i32, i32) {
    %c0_i32 = arith.constant 0 : i32
    %c0_i32_0 = arith.constant 0 : i32
    return %arg0, %c0_i32 : i32, i32
  }
  func.func @transform_1(%arg0: i32) -> (i32, i32) {
    %c0_i32 = arith.constant 0 : i32
    %c0_i32_0 = arith.constant 0 : i32
    return %arg0, %c0_i32 : i32, i32
  }
}

</mosaic_0001>

<bundles_post_ra>
// kernel: tpu_custom_call.1
= control target key start
LH: loop header
LB: loop body
LE: loop exit
PB: predicated region body
PF: predicated region fallthrough
CT: control target
= control target key end

     0   :  { %6 = vsyncpa [#allocation3], 0  ;;  %s546_s0 = inlined_call_operand.hbm [shape: f32[16,128], index: 0, kind: input, shape index: {}]   ;;  %s547_s1 = inlined_call_operand.hbm [shape: f32[16,128], index: 1, kind: output, shape index: {}]  }
   0x1   :  { %8 = vsyncpa [#allocation3 + $0x1], 0 }
   0x2   :  { %9 = vsyncpa [#allocation4], 0 }
   0x3   :  { %11 = vsyncpa [#allocation4 + $0x1], 0  ;;  %s415_s6 = smov 0   ;;  %s417_s7 = smov 0  }
   0x4   :  { %s419_s8 = smov 0   ;;  %s421_s9 = smov 0  }
   0x5 LB: > { %s436_s10 = sadd.s32 4294967295, %s403_s9   ;;  %s245_s11 = sadd.s32 4294967294, %s403_s9   ;;  %s403_s9 = sphi %s421_s9, %s557_s9   ;;  %s399_s8 = sphi %s419_s8, %s556_s8   ;;  %s395_s7 = sphi %s417_s7, %s555_s7   ;;  %s391_s6 = sphi %s415_s6, %s554_s6  }
   0x6   : > { %s440_s12 = sadd.s32 1, %s403_s9   ;;  %s24_s13 = sadd.s32 1, %s399_s8 }
   0x7   : > { %s21_s14 = ssub.s32 %s403_s9, %s440_s12  ;;  %p31_p0 = scmp.ne.s32.totalorder %s399_s8, %s395_s7 }
   0x8   : > { %p22_p1 = scmp.eq.s32.totalorder %s21_s14, 0  ;;  %p32_p2 = scmp.eq.s32.totalorder %s403_s9, 0 }
   0x9   : > { %p37_p3 = scmp.ne.s32.totalorder %s395_s7, %s391_s6  ;;  %p38_p4 = scmp.eq.s32.totalorder %s436_s10, 0 }
   0xa   : > { %s452_s15 = scalar_select %p22_p1, %s399_s8, %s24_s13  }
   0xb   : > { %p454_p5 = por %p32_p2, %p31_p0  ;;  %p458_p6 = por %p38_p4, %p37_p3 }
   0xc   : > { %p61_p7 = scmp.eq.s32.totalorder %s436_s10, 1  ;;  %p67_p8 = scmp.eq.s32.totalorder %s245_s11, 1 }
   0xd   : > { %p269_p10 = scmp.lt.s32.totalorder %s403_s9, 2  ;;  %s87_s20 = sand.u32 1, %s399_s8  }
   0xe   : > { %p465_p11 = por %p61_p7, %p31_p0  ;;  %p469_p12 = por %p67_p8, %p37_p3 }
   0xf   : > { %s249_s21 = sshll.u32 %s403_s9, 3  ;;  %s248_s22 = sshll.u32 %s87_s20, 3 }
  0x10   : > { %s95_s25 = scalar_lea.hbm %s546_s0, %s249_s21  ;;  %s91_s27 = scalar_lea.vmem [#allocation2], %s248_s22 }
  0x11   : > { %s97_s26 = sshll.u32 %s95_s25, 4  ;;  %s99_s28 = sshll.u32 %s91_s27, 4  ;;  %s98_s26 = int_to_ptr.hbm [resolvable:$true] %s97_s26  ;;  %s100_s28 = int_to_ptr.vmem [resolvable:$true] %s99_s28 }
  0x12   : > { %p480_p13 = pnand %p269_p10, %p454_p5  ;;  %p250_p0 = scmp.ge.s32.totalorder %s403_s9, 1 }
  0x13   : > { %p104_p1 = scmp.lt.s32.totalorder %s403_s9, 3  ;;  %s88_s30 = scalar_lea.sflag [#allocation3], %s87_s20 }
  0x14   : > { %s307_s2 = sshra.s32 %s98_s26, 4  ;;  %p311_p3 = pneg %p480_p13  ;;  %s308_s2 = int_to_ptr.hbm [resolvable:$true] %s307_s2 }
  0x15   : > { %s309_s3 = scalar_lea.hbm %s308_s2, 8  ;;  %s314_s11 = scalar_lea.hbm %s546_s0, 16 }
  0x16   : > { %p310_p2 = scmp.ne.s32.totalorder %s308_s2, %s309_s3  ;;  %p315_p5 = scmp.lt.s32.totalorder %s308_s2, %s546_s0 }
  0x17   : > { %p316_p8 = scmp.lt.s32.totalorder %s314_s11, %s309_s3 }
  0x18   : > { %p312_p4 = pnand %p311_p3, %p310_p2 }
  0x19   : > { %p317_p10 = por %p316_p8, %p315_p5 }
  0x1a   : > { %p313_p7 = pneg %p312_p4 }
  0x1c   : > { %p318_p9 = pnand %p317_p10, %p313_p7 }
  0x1e   : > { %321 = shalt.err (!%p318_p9)
}
  0x1f   : > { %264 = dma.hbm_to_vmem [thread:$0]  (!%p480_p13), %s98_s26, 128, %s100_s28, %s88_s30  }
  0x20   : > { %p105_p2 = pnand %p250_p0, %p104_p1 }
  0x21   : > { %s501_s16 = sand.u32 (!%p105_p2), 1, %s395_s7  }
  0x22   : > { %108 = sbr.rel (%p105_p2) target bundleno = 82 (0x52), region = 24  ;;  %s251_s20 = sshll.u32 (!%p105_p2), %s501_s16, 3 }
  0x23   : > { %s111_s21 = scalar_lea.sflag (!%p105_p2), [#allocation3], %s501_s16  ;;  %s114_s22 = scalar_lea.vmem (!%p105_p2), [#allocation2], %s251_s20 }
  0x27   : > { %382 = dma.done.wait (%p458_p6), %s111_s21, 128  }
  0x28   : > { %384 = vsyncadd (%p458_p6), %s111_s21, 4294967168  ;;  %v134_v0 = vld [vmem:[%s114_s22] sm:$0xff]  ;;  %s254_s17 = sshll.u32 %s436_s10, 3  ;;  %s133_s26 = scalar_lea.vmem [#allocation5], %s251_s20 }
  0x29   : > { %v135_v1 = vmin.f32 %v134_v0, 20.0  ;;  %s170_s25 = scalar_lea.hbm %s547_s1, %s254_s17  ;;  %s172_s27 = sshll.u32 %s133_s26, 4  ;;  %s173_s27 = int_to_ptr.vmem [resolvable:$true] %s172_s27 }
  0x2a   : > { %s174_s28 = sshll.u32 %s170_s25, 4  ;;  %s160_s10 = scalar_lea.sflag [#allocation4], %s501_s16  ;;  %s175_s28 = int_to_ptr.hbm [resolvable:$true] %s174_s28 }
  0x2b   : > { %v136_v2 = vmul.f32 1.442695, %v135_v1  ;;  %s351_s29 = sshra.s32 %s175_s28, 4  ;;  %s357_s4 = scalar_lea.hbm %s547_s1, 16  ;;  %s352_s29 = int_to_ptr.hbm [resolvable:$true] %s351_s29 }
  0x2c   : > { %s353_s30 = scalar_lea.hbm %s352_s29, 8  ;;  %p358_p0 = scmp.lt.s32.totalorder %s352_s29, %s547_s1 }
  0x2d   : > { %303 = vpow2.f32 %v136_v2  ;;  %p354_p6 = scmp.ne.s32.totalorder %s352_s29, %s353_s30  ;;  %p359_p1 = scmp.lt.s32.totalorder %s357_s4, %s353_s30 }
  0x2f   : > { %p355_p9 = pnand %p354_p6, %p465_p11  ;;  %p360_p3 = por %p359_p1, %p358_p0 }
  0x31   : > { %p356_p13 = pneg %p355_p9 }
  0x33   : > { %v304_v3 = vpop.eup %303  ;;  %p361_p4 = pnand %p360_p3, %p356_p13 }
  0x34   : > { %v138_v4 = vmul.f32 %v304_v3, %v304_v3  ;;  %v139_v5 = vmul.f32 2.0, %v304_v3 }
  0x36   : > { %v140_v6 = vadd.f32 %v139_v5, %v138_v4 }
  0x38   : > { %v141_v7 = vadd.f32 2.0, %v140_v6 }
  0x3a   : > { %305 = vrcp.f32 %v141_v7  ;;  %v153_v10 = vand.u32 2147483648, %v141_v7  ;;  %vm147_vm0 = vweird.f32 %v141_v7  ;;  %v151_v12 = vand.u32 2147483647, %v141_v7 }
  0x3c   : > { %v154_v14 = vor.u32 1.1754944e-38, %v153_v10  ;;  %vm152_vm3 = vcmp.eq.f32.partialorder %v151_v12, 8.507059e+37 }
  0x40   : > { %v306_v8 = vpop.eup %305 }
  0x41   : > { %v143_v9 = vmul.f32 %v306_v8, %v141_v7  ;;  %vm148_vm1 = vweird.f32 %v306_v8 }
  0x42   : > { %vm149_vm2 = vmor %vm147_vm0, %vm148_vm1 }
  0x43   : > { %v144_v11 = vsub.f32 1.0, %v143_v9 }
  0x45   : > { %v145_v13 = vmul.f32 %v306_v8, %v144_v11 }
  0x47   : > { %v146_v15 = vadd.f32 %v306_v8, %v145_v13 }
  0x49   : > { %v150_v16 = vsel %vm149_vm2, %v306_v8, %v146_v15 }
  0x4a   : > { %v155_v17 = vsel %vm152_vm3, %v154_v14, %v150_v16 }
  0x4b   : > { %v156_v18 = vmul.f32 %v155_v17, %v140_v6 }
  0x4d   : > { %v157_v19 = vmul.f32 %v156_v18, %v134_v0 }
  0x4f   : > { %158 = vst [vmem:[%s133_s26] sm:$0xff] %v157_v19 }
  0x50   : > { %364 = shalt.err (!%p361_p4)
}
  0x51   : > { %259 = dma.vmem_to_hbm [thread:$0]  (%p465_p11), %s173_s27, 128, %s175_s28, %s160_s10  }
  0x52 PF: > { %s186_s13 = sand.u32 1, %s391_s6   ;;  %p553_p7 = scmp.ge.s32.totalorder %s403_s9, 2 }
  0x53   : > { %s187_s14 = scalar_lea.sflag [#allocation4], %s186_s13 }
  0x54   : > { %p266_p5 = pnand %p553_p7, %p469_p12 }
  0x56   : > { %p267_p8 = pneg %p266_p5 }
  0x58   : > { %386 = dma.done.wait (%p267_p8), %s187_s14, 128  }
  0x59   : > { %388 = vsyncadd (%p267_p8), %s187_s14, 4294967168  ;;  %p14_p10 = scmp.ge.s32.totalorder %s440_s12, 4   ;;  %s554_s6 = smov %s395_s7 }
  0x5a   : > { %s555_s7 = smov %s399_s8  ;;  %s556_s8 = smov %s452_s15 }
  0x5b   : > { %s557_s9 = smov %s440_s12  ;;  %16 = sbr.rel (!%p14_p10) target bundleno = 5 (0x5), region = 69 }
  0x60   :  { %193 = vsyncpa [#allocation3], 1 }
  0x61   :  { %195 = vsyncpa [#allocation3 + $0x1], 1 }
  0x62   :  { %196 = vsyncpa [#allocation4], 1 }
  0x63   :  { %198 = vsyncpa [#allocation4 + $0x1], 1 }

</bundles_post_ra>
